<compile_context>
chip_gen: v7x
topology: tpu7x:2x2x1
jax: 0.10.0
libtpu: 0.0.40
codegen_flags: <defaults>
</compile_context>

<pallas_src>
import functools

import jax
import jax.numpy as jnp
from jax.experimental import pallas as pl
from jax.experimental.pallas import tpu as pltpu


def _round_up(v, m):
    return ((v + m - 1) // m) * m


# ---------------------------------------------------------------------------
# Fused 2-layer GIN kernel
# ---------------------------------------------------------------------------
def _fused_gin_kernel(eps_ref,                      # SMEM: (2,) f32
                      x_ref,                        # VMEM: (N_pad, C_pad) f32
                      src0_ref, dst0_ref,           # VMEM: (E0,1), (1,E0) i32
                      src1_ref, dst1_ref,           # VMEM: (E1,1), (1,E1) i32
                      w1a_ref, b1a_ref, w2a_ref, b2a_ref,   # layer 0 MLP
                      w1b_ref, b1b_ref, w2b_ref, b2b_ref,   # layer 1 MLP
                      out_ref):                     # VMEM: (N_pad, H_pad) f32
    n_pad = x_ref.shape[0]

    def gin_layer(x, src_col_ref, dst_row_ref, eps,
                  w1_ref, b1_ref, w2_ref, b2_ref):
        e_pad = src_col_ref.shape[0]
        # one-hot(src): S[e, s] = (src_e == s).  Padded edges carry -1 and
        # therefore produce all-zero rows (contribute nothing).
        src_onehot = (
            jax.lax.broadcasted_iota(jnp.int32, (e_pad, n_pad), 1)
            == src_col_ref[...]).astype(jnp.float32)
        # one-hot(dst) transposed: D[t, e] = (dst_e == t).
        dst_onehot_t = (
            jax.lax.broadcasted_iota(jnp.int32, (n_pad, e_pad), 0)
            == dst_row_ref[...]).astype(jnp.float32)

        # Sum aggregation as two MXU matmuls:
        #   gathered[e, c] = x[src_e, c]        (gather)
        #   agg[t, c]      = sum_e [dst_e==t] * gathered[e, c]   (scatter-add)
        gathered = jnp.dot(src_onehot, x, preferred_element_type=jnp.float32)
        agg = jnp.dot(dst_onehot_t, gathered,
                      preferred_element_type=jnp.float32)

        # (1 + eps) * x_target + agg.  Rows >= n_target only ever hold garbage
        # that no later edge / slice references, so no masking is required.
        h = (1.0 + eps) * x + agg

        # GIN MLP: Linear -> ReLU -> Linear, then the Encoder's ReLU.
        z = jnp.maximum(
            jnp.dot(h, w1_ref[...], preferred_element_type=jnp.float32)
            + b1_ref[...], 0.0)
        o = jnp.dot(z, w2_ref[...], preferred_element_type=jnp.float32) \
            + b2_ref[...]
        return jnp.maximum(o, 0.0)

    x1 = gin_layer(x_ref[...], src0_ref, dst0_ref, eps_ref[0],
                   w1a_ref, b1a_ref, w2a_ref, b2a_ref)
    x2 = gin_layer(x1, src1_ref, dst1_ref, eps_ref[1],
                   w1b_ref, b1b_ref, w2b_ref, b2b_ref)
    out_ref[...] = x2


# ---------------------------------------------------------------------------
# Jitted wrapper: padding + single pallas_call + final slice
# ---------------------------------------------------------------------------
def _edge_vectors(edge_index, e_pad):
    """Pad the edge list to e_pad with -1 sentinels; return (src col, dst row)."""
    e = edge_index.shape[1]
    ei = edge_index.astype(jnp.int32)
    src = jnp.pad(ei[0], (0, e_pad - e), constant_values=-1)
    dst = jnp.pad(ei[1], (0, e_pad - e), constant_values=-1)
    return src.reshape(e_pad, 1), dst.reshape(1, e_pad)


@functools.partial(jax.jit, static_argnames=("n_out",))
def _fused_encoder(x, ei0, ei1,
                   eps0, w1a, b1a, w2a, b2a,
                   eps1, w1b, b1b, w2b, b2b, *, n_out):
    n0, c_in = x.shape
    hidden = w1a.shape[1]

    n_pad = _round_up(max(n0, 8), 8)          # sublane-aligned node rows
    c_pad = _round_up(max(c_in, 128), 128)    # lane-dense input channels
    h_pad = _round_up(max(hidden, 128), 128)  # lane-dense hidden channels
    e0_pad = _round_up(max(ei0.shape[1], 8), 8)
    e1_pad = _round_up(max(ei1.shape[1], 8), 8)

    # Zero padding is exact: padded channels / rows stay identically zero
    # through both layers and are sliced away at the end.
    x_p = jnp.pad(x, ((0, n_pad - n0), (0, c_pad - c_in)))
    w1a_p = jnp.pad(w1a, ((0, c_pad - c_in), (0, h_pad - hidden)))
    b1a_p = jnp.pad(b1a, ((0, 0), (0, h_pad - hidden)))
    w2a_p = jnp.pad(w2a, ((0, h_pad - hidden), (0, h_pad - hidden)))
    b2a_p = jnp.pad(b2a, ((0, 0), (0, h_pad - hidden)))
    w1b_p = jnp.pad(w1b, ((0, h_pad - hidden), (0, h_pad - hidden)))
    b1b_p = jnp.pad(b1b, ((0, 0), (0, h_pad - hidden)))
    w2b_p = jnp.pad(w2b, ((0, h_pad - hidden), (0, h_pad - hidden)))
    b2b_p = jnp.pad(b2b, ((0, 0), (0, h_pad - hidden)))

    src0, dst0 = _edge_vectors(ei0, e0_pad)
    src1, dst1 = _edge_vectors(ei1, e1_pad)
    eps = jnp.concatenate([eps0, eps1]).astype(jnp.float32)

    vmem = pl.BlockSpec(memory_space=pltpu.MemorySpace.VMEM)
    smem = pl.BlockSpec(memory_space=pltpu.MemorySpace.SMEM)

    out_pad = pl.pallas_call(
        _fused_gin_kernel,
        out_shape=jax.ShapeDtypeStruct((n_pad, h_pad), jnp.float32),
        # No grid: every operand is a single full-array block resident in VMEM
        # (shapes are tiny); eps lives in SMEM as scalar parameters.
        in_specs=[smem] + [vmem] * 13,
        out_specs=vmem,
    )(eps, x_p, src0, dst0, src1, dst1,
      w1a_p, b1a_p, w2a_p, b2a_p, w1b_p, b1b_p, w2b_p, b2b_p)

    return out_pad[:n_out, :hidden]


def encoder_forward(x, adjs, params):
    """Mirrors Encoder.forward(x, adjs) for the 2-layer Encoder."""
    assert len(adjs) == 2 and len(params) == 2
    (ei0, _e0, _size0), (ei1, _e1, size1) = adjs
    p0, p1 = params
    return _fused_encoder(
        x, ei0, ei1,
        p0["eps"], p0["w1"], p0["b1"], p0["w2"], p0["b2"],
        p1["eps"], p1["w1"], p1["b1"], p1["w2"], p1["b2"],
        n_out=int(size1[1]))


# ---------------------------------------------------------------------------
# Pure-JAX reference (for correctness validation)
# ---------------------------------------------------------------------------
def encoder_forward_ref(x, adjs, params):
    for i, (edge_index, _ea, size) in enumerate(adjs):
        _n_src, n_tgt = size
        x_target = x[:n_tgt]
        agg = jnp.zeros((n_tgt, x.shape[1]), jnp.float32).at[
            edge_index[1]].add(x[edge_index[0]])
        p = params[i]
        h = (1.0 + p["eps"][0]) * x_target + agg
        z = jnp.maximum(h @ p["w1"] + p["b1"], 0.0)
        o = z @ p["w2"] + p["b2"]
        x = jnp.maximum(o, 0.0)
    return x


def init_params(key, in_channels, hidden_channels):
    ks = jax.random.split(key, 4)
    def layer(k0, k1, c_in, c_out):
        return {
            "eps": jnp.zeros((1,), jnp.float32),  # GIN eps initialised to 0
            "w1": 0.1 * jax.random.normal(k0, (c_in, c_out), jnp.float32),
            "b1": jnp.zeros((1, c_out), jnp.float32),
            "w2": 0.1 * jax.random.normal(k1, (c_out, c_out), jnp.float32),
            "b2": jnp.zeros((1, c_out), jnp.float32),
        }
    return [layer(ks[0], ks[1], in_channels, hidden_channels),
            layer(ks[2], ks[3], hidden_channels, hidden_channels)]


if __name__ == "__main__":
    key = jax.random.PRNGKey(0)
    in_channels, hidden_channels = 4, 32
    n0 = 16                       # total sampled nodes fed to layer 0
    sizes = [(16, 12), (12, 8)]   # (num_source, num_target) per sampled hop
    num_edges = [40, 24]

    keys = jax.random.split(key, 8)
    x = jax.random.normal(keys[0], (n0, in_channels), dtype=jnp.float32)

    adjs = []
    for li, ((n_s, n_t), ne) in enumerate(zip(sizes, num_edges)):
        src = jax.random.randint(keys[2 * li + 1], (ne,), 0, n_s)
        dst = jax.random.randint(keys[2 * li + 2], (ne,), 0, n_t)
        edge_index = jnp.stack([src, dst]).astype(jnp.int32)
        adjs.append((edge_index, None, (n_s, n_t)))

    params = init_params(keys[7], in_channels, hidden_channels)

    out = encoder_forward(x, adjs, params)
    out = jax.block_until_ready(out)

    ref = encoder_forward_ref(x, adjs, params)
    assert out.shape == (sizes[-1][1], hidden_channels)
    max_err = float(jnp.max(jnp.abs(out - ref)))
    assert bool(jnp.allclose(out, ref, rtol=1e-4, atol=1e-4)), max_err
    assert bool(jnp.all(out >= 0.0))  # final ReLU
    print("KERNEL_OK")
</pallas_src>

<mosaic_0001>
module attributes {stable_mosaic.version = 11 : i64} {
  func.func @_fused_gin_kernel(%arg0: memref<2xf32, #tpu.memory_space<smem>>, %arg1: memref<16x128xf32, #tpu.memory_space<vmem>>, %arg2: memref<40x1xi32, #tpu.memory_space<vmem>>, %arg3: memref<1x40xi32, #tpu.memory_space<vmem>>, %arg4: memref<24x1xi32, #tpu.memory_space<vmem>>, %arg5: memref<1x24xi32, #tpu.memory_space<vmem>>, %arg6: memref<128x128xf32, #tpu.memory_space<vmem>>, %arg7: memref<1x128xf32, #tpu.memory_space<vmem>>, %arg8: memref<128x128xf32, #tpu.memory_space<vmem>>, %arg9: memref<1x128xf32, #tpu.memory_space<vmem>>, %arg10: memref<128x128xf32, #tpu.memory_space<vmem>>, %arg11: memref<1x128xf32, #tpu.memory_space<vmem>>, %arg12: memref<128x128xf32, #tpu.memory_space<vmem>>, %arg13: memref<1x128xf32, #tpu.memory_space<vmem>>, %arg14: memref<16x128xf32, #tpu.memory_space<vmem>>) attributes {dimension_semantics = [], scalar_prefetch = 0 : i64, scratch_operands = 0 : i64, tpu.core_type = #tpu.core_type<tc>} {
    %c0 = arith.constant 0 : index
    %c0_0 = arith.constant 0 : index
    %0 = vector.load %arg1[%c0, %c0_0] : memref<16x128xf32, #tpu.memory_space<vmem>>, vector<16x128xf32>
    %c0_1 = arith.constant 0 : index
    %1 = memref.load %arg0[%c0_1] : memref<2xf32, #tpu.memory_space<smem>>
    %2 = tpu.iota {dimensions = array<i32: 1>} : vector<40x16xi32>
    %c0_2 = arith.constant 0 : index
    %c0_3 = arith.constant 0 : index
    %3 = vector.load %arg2[%c0_2, %c0_3] : memref<40x1xi32, #tpu.memory_space<vmem>>, vector<40x1xi32>
    %4 = vector.broadcast %3 : vector<40x1xi32> to vector<40x16xi32>
    %5 = arith.cmpi eq, %2, %4 : vector<40x16xi32>
    %6 = arith.extui %5 : vector<40x16xi1> to vector<40x16xi32>
    %7 = arith.sitofp %6 : vector<40x16xi32> to vector<40x16xf32>
    %8 = tpu.iota {dimensions = array<i32: 0>} : vector<16x40xi32>
    %c0_4 = arith.constant 0 : index
    %c0_5 = arith.constant 0 : index
    %9 = vector.load %arg3[%c0_4, %c0_5] : memref<1x40xi32, #tpu.memory_space<vmem>>, vector<1x40xi32>
    %10 = vector.broadcast %9 : vector<1x40xi32> to vector<16x40xi32>
    %11 = arith.cmpi eq, %8, %10 : vector<16x40xi32>
    %12 = arith.extui %11 : vector<16x40xi1> to vector<16x40xi32>
    %13 = arith.sitofp %12 : vector<16x40xi32> to vector<16x40xf32>
    %cst = arith.constant dense<0.000000e+00> : vector<40x128xf32>
    %14 = tpu.matmul %7, %0, %cst {dimension_numbers = #tpu.dot_dimension_numbers<[1], [0], [0], [1], [0, 0, 1, 1], [], []>} : vector<40x16xf32>, vector<16x128xf32>, vector<40x128xf32> -> vector<40x128xf32>
    %cst_6 = arith.constant dense<0.000000e+00> : vector<16x128xf32>
    %15 = tpu.matmul %13, %14, %cst_6 {dimension_numbers = #tpu.dot_dimension_numbers<[1], [0], [0], [1], [0, 0, 1, 1], [], []>} : vector<16x40xf32>, vector<40x128xf32>, vector<16x128xf32> -> vector<16x128xf32>
    %cst_7 = arith.constant 1.000000e+00 : f32
    %16 = arith.addf %cst_7, %1 : f32
    %17 = vector.broadcast %16 : f32 to vector<16x128xf32>
    %18 = arith.mulf %17, %0 : vector<16x128xf32>
    %19 = arith.addf %18, %15 : vector<16x128xf32>
    %c0_8 = arith.constant 0 : index
    %c0_9 = arith.constant 0 : index
    %20 = vector.load %arg6[%c0_8, %c0_9] : memref<128x128xf32, #tpu.memory_space<vmem>>, vector<128x128xf32>
    %cst_10 = arith.constant dense<0.000000e+00> : vector<16x128xf32>
    %21 = tpu.matmul %19, %20, %cst_10 {dimension_numbers = #tpu.dot_dimension_numbers<[1], [0], [0], [1], [0, 0, 1, 1], [], []>} : vector<16x128xf32>, vector<128x128xf32>, vector<16x128xf32> -> vector<16x128xf32>
    %c0_11 = arith.constant 0 : index
    %c0_12 = arith.constant 0 : index
    %22 = vector.load %arg7[%c0_11, %c0_12] : memref<1x128xf32, #tpu.memory_space<vmem>>, vector<1x128xf32>
    %23 = vector.broadcast %22 : vector<1x128xf32> to vector<16x128xf32>
    %24 = arith.addf %21, %23 : vector<16x128xf32>
    %cst_13 = arith.constant 0.000000e+00 : f32
    %25 = vector.broadcast %cst_13 : f32 to vector<16x128xf32>
    %26 = arith.maximumf %24, %25 : vector<16x128xf32>
    %c0_14 = arith.constant 0 : index
    %c0_15 = arith.constant 0 : index
    %27 = vector.load %arg8[%c0_14, %c0_15] : memref<128x128xf32, #tpu.memory_space<vmem>>, vector<128x128xf32>
    %cst_16 = arith.constant dense<0.000000e+00> : vector<16x128xf32>
    %28 = tpu.matmul %26, %27, %cst_16 {dimension_numbers = #tpu.dot_dimension_numbers<[1], [0], [0], [1], [0, 0, 1, 1], [], []>} : vector<16x128xf32>, vector<128x128xf32>, vector<16x128xf32> -> vector<16x128xf32>
    %c0_17 = arith.constant 0 : index
    %c0_18 = arith.constant 0 : index
    %29 = vector.load %arg9[%c0_17, %c0_18] : memref<1x128xf32, #tpu.memory_space<vmem>>, vector<1x128xf32>
    %30 = vector.broadcast %29 : vector<1x128xf32> to vector<16x128xf32>
    %31 = arith.addf %28, %30 : vector<16x128xf32>
    %cst_19 = arith.constant 0.000000e+00 : f32
    %32 = vector.broadcast %cst_19 : f32 to vector<16x128xf32>
    %33 = arith.maximumf %31, %32 : vector<16x128xf32>
    %c1 = arith.constant 1 : index
    %34 = memref.load %arg0[%c1] : memref<2xf32, #tpu.memory_space<smem>>
    %35 = tpu.iota {dimensions = array<i32: 1>} : vector<24x16xi32>
    %c0_20 = arith.constant 0 : index
    %c0_21 = arith.constant 0 : index
    %36 = vector.load %arg4[%c0_20, %c0_21] : memref<24x1xi32, #tpu.memory_space<vmem>>, vector<24x1xi32>
    %37 = vector.broadcast %36 : vector<24x1xi32> to vector<24x16xi32>
    %38 = arith.cmpi eq, %35, %37 : vector<24x16xi32>
    %39 = arith.extui %38 : vector<24x16xi1> to vector<24x16xi32>
    %40 = arith.sitofp %39 : vector<24x16xi32> to vector<24x16xf32>
    %41 = tpu.iota {dimensions = array<i32: 0>} : vector<16x24xi32>
    %c0_22 = arith.constant 0 : index
    %c0_23 = arith.constant 0 : index
    %42 = vector.load %arg5[%c0_22, %c0_23] : memref<1x24xi32, #tpu.memory_space<vmem>>, vector<1x24xi32>
    %43 = vector.broadcast %42 : vector<1x24xi32> to vector<16x24xi32>
    %44 = arith.cmpi eq, %41, %43 : vector<16x24xi32>
    %45 = arith.extui %44 : vector<16x24xi1> to vector<16x24xi32>
    %46 = arith.sitofp %45 : vector<16x24xi32> to vector<16x24xf32>
    %cst_24 = arith.constant dense<0.000000e+00> : vector<24x128xf32>
    %47 = tpu.matmul %40, %33, %cst_24 {dimension_numbers = #tpu.dot_dimension_numbers<[1], [0], [0], [1], [0, 0, 1, 1], [], []>} : vector<24x16xf32>, vector<16x128xf32>, vector<24x128xf32> -> vector<24x128xf32>
    %cst_25 = arith.constant dense<0.000000e+00> : vector<16x128xf32>
    %48 = tpu.matmul %46, %47, %cst_25 {dimension_numbers = #tpu.dot_dimension_numbers<[1], [0], [0], [1], [0, 0, 1, 1], [], []>} : vector<16x24xf32>, vector<24x128xf32>, vector<16x128xf32> -> vector<16x128xf32>
    %cst_26 = arith.constant 1.000000e+00 : f32
    %49 = arith.addf %cst_26, %34 : f32
    %50 = vector.broadcast %49 : f32 to vector<16x128xf32>
    %51 = arith.mulf %50, %33 : vector<16x128xf32>
    %52 = arith.addf %51, %48 : vector<16x128xf32>
    %c0_27 = arith.constant 0 : index
    %c0_28 = arith.constant 0 : index
    %53 = vector.load %arg10[%c0_27, %c0_28] : memref<128x128xf32, #tpu.memory_space<vmem>>, vector<128x128xf32>
    %cst_29 = arith.constant dense<0.000000e+00> : vector<16x128xf32>
    %54 = tpu.matmul %52, %53, %cst_29 {dimension_numbers = #tpu.dot_dimension_numbers<[1], [0], [0], [1], [0, 0, 1, 1], [], []>} : vector<16x128xf32>, vector<128x128xf32>, vector<16x128xf32> -> vector<16x128xf32>
    %c0_30 = arith.constant 0 : index
    %c0_31 = arith.constant 0 : index
    %55 = vector.load %arg11[%c0_30, %c0_31] : memref<1x128xf32, #tpu.memory_space<vmem>>, vector<1x128xf32>
    %56 = vector.broadcast %55 : vector<1x128xf32> to vector<16x128xf32>
    %57 = arith.addf %54, %56 : vector<16x128xf32>
    %cst_32 = arith.constant 0.000000e+00 : f32
    %58 = vector.broadcast %cst_32 : f32 to vector<16x128xf32>
    %59 = arith.maximumf %57, %58 : vector<16x128xf32>
    %c0_33 = arith.constant 0 : index
    %c0_34 = arith.constant 0 : index
    %60 = vector.load %arg12[%c0_33, %c0_34] : memref<128x128xf32, #tpu.memory_space<vmem>>, vector<128x128xf32>
    %cst_35 = arith.constant dense<0.000000e+00> : vector<16x128xf32>
    %61 = tpu.matmul %59, %60, %cst_35 {dimension_numbers = #tpu.dot_dimension_numbers<[1], [0], [0], [1], [0, 0, 1, 1], [], []>} : vector<16x128xf32>, vector<128x128xf32>, vector<16x128xf32> -> vector<16x128xf32>
    %c0_36 = arith.constant 0 : index
    %c0_37 = arith.constant 0 : index
    %62 = vector.load %arg13[%c0_36, %c0_37] : memref<1x128xf32, #tpu.memory_space<vmem>>, vector<1x128xf32>
    %63 = vector.broadcast %62 : vector<1x128xf32> to vector<16x128xf32>
    %64 = arith.addf %61, %63 : vector<16x128xf32>
    %cst_38 = arith.constant 0.000000e+00 : f32
    %65 = vector.broadcast %cst_38 : f32 to vector<16x128xf32>
    %66 = arith.maximumf %64, %65 : vector<16x128xf32>
    %c0_39 = arith.constant 0 : index
    %c0_40 = arith.constant 0 : index
    %67 = vector.load %arg14[%c0_39, %c0_40] : memref<16x128xf32, #tpu.memory_space<vmem>>, vector<16x128xf32>
    tpu.vector_store %arg14[%c0_39, %c0_40], %66 {strides = array<i32>} : memref<16x128xf32, #tpu.memory_space<vmem>>, vector<16x128xf32>,
    return
  }
}

</mosaic_0001>

<bundles_post_ra>
// kernel: _fused_encoder.1
= control target key start
LH: loop header
LB: loop body
LE: loop exit
PB: predicated region body
PF: predicated region fallthrough
CT: control target
= control target key end

     0   :  { %19 = vsyncpa [#allocation3], 0  ;;  %s1825_s0 = inlined_call_operand.vmem [shape: f32[2], index: 0, kind: input, shape index: {}]   ;;  %s1826_s1 = inlined_call_operand.vmem [shape: f32[16,128], index: 1, kind: input, shape index: {}]   ;;  %s1827_s2 = inlined_call_operand.vmem [shape: s32[40,1], index: 2, kind: input, shape index: {}]   ;;  %s1828_s3 = inlined_call_operand.vmem [shape: s32[1,40], index: 3, kind: input, shape index: {}]   ;;  %s1829_s4 = inlined_call_operand.vmem [shape: s32[24,1], index: 4, kind: input, shape index: {}]   ;;  %s1830_s5 = inlined_call_operand.vmem [shape: s32[1,24], index: 5, kind: input, shape index: {}]   ;;  %s1831_s6 = inlined_call_operand.vmem [shape: f32[128,128], index: 6, kind: input, shape index: {}]   ;;  %s1832_s7 = inlined_call_operand.vmem [shape: f32[1,128], index: 7, kind: input, shape index: {}]   ;;  %s1833_s8 = inlined_call_operand.vmem [shape: f32[128,128], index: 8, kind: input, shape index: {}]   ;;  %s1834_s9 = inlined_call_operand.vmem [shape: f32[1,128], index: 9, kind: input, shape index: {}]   ;;  %s1835_s10 = inlined_call_operand.vmem [shape: f32[128,128], index: 10, kind: input, shape index: {}]   ;;  %s1836_s11 = inlined_call_operand.vmem [shape: f32[1,128], index: 11, kind: input, shape index: {}]   ;;  %s1837_s12 = inlined_call_operand.vmem [shape: f32[128,128], index: 12, kind: input, shape index: {}]   ;;  %s1838_s13 = inlined_call_operand.vmem [shape: f32[1,128], index: 13, kind: input, shape index: {}]   ;;  %s1839_s14 = inlined_call_operand.vmem [shape: f32[16,128], index: 14, kind: output, shape index: {}]  }
   0x1   :  { %s26_s15 = sshll.u32 %s1825_s0, 4  ;;  %s27_s15 = int_to_ptr.vmem [resolvable:$true] %s26_s15 }
   0x2   :  { %s1399_s16 = scalar_lea.vmem %s27_s15, 16  ;;  %p1404_p1 = scmp.lt.s32.totalorder %s27_s15, %s27_s15 }
   0x3   :  { %p1400_p0 = scmp.ne.s32.totalorder %s27_s15, %s1399_s16  ;;  %p1405_p2 = scmp.lt.s32.totalorder %s1399_s16, %s1399_s16 }
   0x5   :  { %p1406_p3 = por %p1405_p2, %p1404_p1 }
   0x7   :  { %p1407_p4 = pnand %p1406_p3, %p1400_p0 }
   0x9   :  { %1410 = shalt.err (!%p1407_p4)
}
   0xa   :  { %s1413_s17 = smov [#allocation2]  }
   0xb   :  { %29 = dma.vmem_to_smem %s27_s15, 16, %s1413_s17, [#allocation3]  }
   0xc   :  { %1411 = dma.done.wait [#allocation3], 16  }
   0xd   :  { %1412 = vsyncadd [#allocation3], 4294967280 }
   0xe   :  { %59 = sfence }
   0xf   :  { %v67_v0 = vld [vmem:[%s1827_s2 + $0x10] sm:$0xff]  ;;  %v65_v1 = vld [vmem:[%s1827_s2] sm:$0xff]  ;;  %v1414_v2 = vmov 0   ;;  %v68_v4 = vld [vmem:[%s1827_s2 + $0x18] sm:$0xff]  ;;  %v1415_v6 = vmov 0.0|0.0   ;;  %vm1416_vm0 = vmmov 0   ;;  %v63_v14 = vlaneseq }
  0x10   :  { %1398 = vset.pattern.permute.xlu1 %v1414_v2  ;;  %1397 = vset.pattern.permute.xlu0 %v1414_v2  ;;  %v1505_v3 = vld [vmem:[%s1826_s1] sm:$0xff]  ;;  %v66_v5 = vld [vmem:[%s1827_s2 + $0x8] sm:$0xff]  ;;  %v1417_v8 = vmov 0.0   ;;  %v511_v12 = vld [vmem:[%s1829_s4 + $0x10] sm:$0xff]  ;;  %vm114_vm1 = vcmask 130048   ;;  %vm220_vm8 = vcmask 326656  }
  0x11   :  { %77 = vperm.xlu1 %1398, %v67_v0   ;;  %71 = vperm.xlu0 %1397, %v65_v1   ;;  %v1517_v7 = vld [vmem:[%s1826_s1 + $0x8] sm:$0xff]  ;;  %v509_v10 = vld [vmem:[%s1829_s4] sm:$0xff]  ;;  %v1535_v15 = vand.u32 127, %v63_v14  ;;  %v1560_v26 = vshrl.u32 %v63_v14, 7  ;;  %v310_v31 = vld [vmem:[%s1831_s6 + $0x10] sm:$0xff]  ;;  %s62_s18 = sld [smem:[#allocation2]] }
  0x12   :  { %1246 = vmatprep.subr.bf16.mxu0 %v1415_v6  ;;  %1056 = vmatprep.mubr.msk.f32.mxu0 %vm1416_vm0, %v1417_v8  ;;  %v1247_v9 = vpack.c.bf16 %v1517_v7, %v1505_v3  ;;  %v69_v11 = vld [vmem:[%s1827_s2 + $0x20] sm:$0xff]  ;;  %v510_v13 = vld [vmem:[%s1829_s4 + $0x8] sm:$0xff]  ;;  %v311_v33 = vld [vmem:[%s1831_s6 + $0x18] sm:$0xff]  ;;  %vm630_vm14 = vcmask 195584   ;;  %s942_s28 = sld [smem:[#allocation2 + $0x1]] }
  0x13   :  { %v930_v27 = vld [vmem:[%s1828_s3] ss:$0 sm:$0xff]  ;;  %v309_v30 = vld [vmem:[%s1831_s6 + $0x8] sm:$0xff]  ;;  %v1261_v34 = vpack.c.bf16 %v311_v33, %v310_v31  ;;  %v314_v38 = vld [vmem:[%s1831_s6 + $0x30] sm:$0xff]  ;;  %v1611_v57 = vadd.s32 8, %v1560_v26 }
  0x14   :  { %1248 = vmatpush3.bf16.msra.mxu0 %v1247_v9  ;;  %vm108_vm7 = vcmp.eq.s32.totalorder %v1560_v26, %v930_v27  ;;  %v308_v29 = vld [vmem:[%s1831_s6] sm:$0xff]  ;;  %v313_v36 = vld [vmem:[%s1831_s6 + $0x28] sm:$0xff]  ;;  %v315_v39 = vld [vmem:[%s1831_s6 + $0x38] sm:$0xff] }
  0x15   :  { %80 = vperm.xlu1 %1398, %v68_v4   ;;  %74 = vperm.xlu0 %1397, %v66_v5   ;;  %v931_v28 = vsel %vm108_vm7, 1.0, %v1417_v8  ;;  %v1257_v32 = vpack.c.bf16 %v309_v30, %v308_v29  ;;  %v312_v35 = vld [vmem:[%s1831_s6 + $0x20] sm:$0xff]  ;;  %v1269_v40 = vpack.c.bf16 %v315_v39, %v314_v38  ;;  %v317_v42 = vld [vmem:[%s1831_s6 + $0x48] sm:$0xff]  ;;  %v318_v44 = vld [vmem:[%s1831_s6 + $0x50] sm:$0xff]  ;;  %vm109_vm9 = vcmp.eq.s32.totalorder %v1611_v57, %v930_v27 }
  0x16   :  { %1081 = vmatprep.mubr.msk.f32.mxu1 %vm220_vm8, %v931_v28  ;;  %v1265_v37 = vpack.c.bf16 %v313_v36, %v312_v35  ;;  %v316_v41 = vld [vmem:[%s1831_s6 + $0x40] sm:$0xff]  ;;  %v319_v45 = vld [vmem:[%s1831_s6 + $0x58] sm:$0xff]  ;;  %v321_v48 = vld [vmem:[%s1831_s6 + $0x68] sm:$0xff]  ;;  %v932_v63 = vsel %vm109_vm9, 1.0, %v1417_v8 }
  0x17   :  { %1258 = vmatprep.subr.bf16.mxu0 %v1257_v32  ;;  %v1273_v43 = vpack.c.bf16 %v317_v42, %v316_v41  ;;  %v1277_v46 = vpack.c.bf16 %v319_v45, %v318_v44  ;;  %v320_v47 = vld [vmem:[%s1831_s6 + $0x60] sm:$0xff]  ;;  %v322_v0 = vld [vmem:[%s1831_s6 + $0x70] sm:$0xff]  ;;  %v323_v1 = vld [vmem:[%s1831_s6 + $0x78] sm:$0xff]  ;;  %s302_s6 = sadd.f32 1.0, %s62_s18 }
  0x18   :  { %v1281_v49 = vpack.c.bf16 %v321_v48, %v320_v47  ;;  %v1285_v2 = vpack.c.bf16 %v323_v1, %v322_v0  ;;  %v408_v4 = vld [vmem:[%s1833_s8] sm:$0xff]  ;;  %v409_v5 = vld [vmem:[%s1833_s8 + $0x8] sm:$0xff]  ;;  %v410_v9 = vld [vmem:[%s1833_s8 + $0x10] sm:$0xff]  ;;  %s712_s29 = sadd.f32 1.0, %s942_s28 }
  0x19   :  { %513 = vperm.xlu1 %1398, %v509_v10   ;;  %83 = vperm.xlu0 %1397, %v69_v11   ;;  %v1289_v10 = vpack.c.bf16 %v409_v5, %v408_v4  ;;  %v411_v11 = vld [vmem:[%s1833_s8 + $0x18] sm:$0xff]  ;;  %v421_v27 = vld [vmem:[%s1833_s8 + $0x68] sm:$0xff]  ;;  %v303_v29 = vstv %s302_s6  ;;  %v422_v36 = vld [vmem:[%s1833_s8 + $0x70] sm:$0xff] }
  0x1a   :  { %v304_v30 = vmul.f32 %v303_v29, %v1505_v3  ;;  %v305_v31 = vmul.f32 %v303_v29, %v1517_v7  ;;  %v940_v7 = vld [vmem:[%s1832_s7] ss:$0 sm:$0xff]  ;;  %v724_v5 = vld [vmem:[%s1835_s10 + $0x30] sm:$0xff] }
  0x1b   :  { %v941_v44 = vld [vmem:[%s1834_s9] ss:$0 sm:$0xff]  ;;  %v732_v29 = vld [vmem:[%s1835_s10 + $0x70] sm:$0xff] }
  0x1c   :  { %v722_v1 = vld [vmem:[%s1835_s10 + $0x20] sm:$0xff] }
  0x1d   :  { %519 = vperm.xlu1 %1398, %v511_v12   ;;  %516 = vperm.xlu0 %1397, %v510_v13   ;;  %v1293_v12 = vpack.c.bf16 %v411_v11, %v410_v9  ;;  %v413_v13 = vld [vmem:[%s1833_s8 + $0x28] sm:$0xff]  ;;  %v725_v9 = vld [vmem:[%s1835_s10 + $0x38] sm:$0xff]  ;;  %v726_v11 = vld [vmem:[%s1835_s10 + $0x40] sm:$0xff] }
  0x90   :  { %v72_v16 = vpop.permute.xlu0 %71  ;;  %v78_v18 = vpop.permute.xlu1 %77 }
  0x91   :  { %vm85_vm2 = vcmp.eq.s32.totalorder %v1535_v15, %v72_v16  ;;  %vm87_vm3 = vcmp.eq.s32.totalorder %v1535_v15, %v78_v18  ;;  %v414_v16 = vld [vmem:[%s1833_s8 + $0x30] sm:$0xff] }
  0x92   :  { %v925_v17 = vsel %vm85_vm2, 1.0, %v1417_v8  ;;  %v927_v21 = vsel %vm87_vm3, 1.0, %v1417_v8 }
  0x93   :  { %1057 = vmatmul.mubr.msk.f32.vlgmr.msra.gmra.mrb[0].mxu0 %vm114_vm1, %v925_v17  ;;  %v415_v17 = vld [vmem:[%s1833_s8 + $0x38] sm:$0xff] }
  0x94   :  { %v75_v19 = vpop.permute.xlu0 %74  ;;  %1059 = vmatprep.mubr.msk.f32.mxu0 %vm1416_vm0, %v1417_v8  ;;  %v81_v22 = vpop.permute.xlu1 %80  ;;  %1260 = vmatpush3.bf16.msra.mxu0 %v1257_v32  ;;  %v1301_v18 = vpack.c.bf16 %v415_v17, %v414_v16  ;;  %v730_v17 = vld [vmem:[%s1835_s10 + $0x60] sm:$0xff] }
  0x95   :  { %vm86_vm4 = vcmp.eq.s32.totalorder %v1535_v15, %v75_v19  ;;  %vm88_vm5 = vcmp.eq.s32.totalorder %v1535_v15, %v81_v22  ;;  %1262 = vmatprep.subr.bf16.mxu0 %v1261_v34  ;;  %v416_v19 = vld [vmem:[%s1833_s8 + $0x40] sm:$0xff]  ;;  %v418_v22 = vld [vmem:[%s1833_s8 + $0x50] sm:$0xff] }
  0x96   :  { %v926_v20 = vsel %vm86_vm4, 1.0, %v1417_v8  ;;  %v928_v24 = vsel %vm88_vm5, 1.0, %v1417_v8 }
  0x97   :  { %1060 = vmatmul.mubr.msk.f32.gmra.mrb[2].mxu0 %vm114_vm1, %v926_v20  ;;  %v417_v20 = vld [vmem:[%s1833_s8 + $0x48] sm:$0xff] }
  0x98   :  { %1062 = vmatprep.mubr.msk.f32.mxu0 %vm1416_vm0, %v1417_v8  ;;  %v84_v23 = vpop.permute.xlu0 %83  ;;  %1264 = vmatpush3.bf16.msra.mxu0 %v1261_v34 }
  0x99   :  { %vm89_vm6 = vcmp.eq.s32.totalorder %v1535_v15, %v84_v23  ;;  %1266 = vmatprep.subr.bf16.mxu0 %v1265_v37  ;;  %v419_v23 = vld [vmem:[%s1833_s8 + $0x58] sm:$0xff] }
  0x9a   :  { %v929_v25 = vsel %vm89_vm6, 1.0, %v1417_v8 }
  0x9b   :  { %1063 = vmatmul.mubr.msk.f32.gmra.mrb[4].mxu0 %vm114_vm1, %v927_v21  ;;  %v1305_v21 = vpack.c.bf16 %v417_v20, %v416_v19 }
  0x9c   :  { %1065 = vmatprep.mubr.msk.f32.mxu0 %vm1416_vm0, %v1417_v8  ;;  %1268 = vmatpush3.bf16.msra.mxu0 %v1265_v37  ;;  %v423_v37 = vld [vmem:[%s1833_s8 + $0x78] sm:$0xff] }
  0x9d   :  { %1270 = vmatprep.subr.bf16.mxu0 %v1269_v40  ;;  %v1317_v3 = vpack.c.bf16 %v423_v37, %v422_v36  ;;  %v822_v36 = vld [vmem:[%s1837_s12 + $0x20] sm:$0xff]  ;;  %v823_v37 = vld [vmem:[%s1837_s12 + $0x28] sm:$0xff] }
  0x9f   :  { %1066 = vmatmul.mubr.msk.f32.gmra.mrb[6].mxu0 %vm114_vm1, %v928_v24  ;;  %v1309_v24 = vpack.c.bf16 %v419_v23, %v418_v22 }
  0xa0   :  { %1068 = vmatprep.mubr.msk.f32.mxu0 %vm1416_vm0, %v1417_v8  ;;  %1272 = vmatpush3.bf16.msra.mxu0 %v1269_v40 }
  0xa1   :  { %1274 = vmatprep.subr.bf16.mxu0 %v1273_v43 }
  0xa3   :  { %1069 = vmatmul.mubr.msk.f32.gmra.mrb[8].mxu0 %vm114_vm1, %v929_v25  ;;  %v420_v25 = vld [vmem:[%s1833_s8 + $0x60] sm:$0xff] }
  0xa4   :  { %1276 = vmatpush3.bf16.msra.mxu0 %v1273_v43  ;;  %v1313_v28 = vpack.c.bf16 %v421_v27, %v420_v25 }
  0xa5   :  { %1278 = vmatprep.subr.bf16.mxu0 %v1277_v46 }
  0xa8   :  { %1280 = vmatpush3.bf16.msra.mxu0 %v1277_v46 }
  0xa9   :  { %1282 = vmatprep.subr.bf16.mxu0 %v1281_v49 }
  0xac   :  { %1284 = vmatpush3.bf16.msra.mxu0 %v1281_v49 }
  0xad   :  { %1286 = vmatprep.subr.bf16.mxu0 %v1285_v2 }
  0xb0   :  { %1288 = vmatpush3.bf16.msra.mxu0 %v1285_v2  ;;  %v723_v2 = vld [vmem:[%s1835_s10 + $0x28] sm:$0xff] }
  0xb1   :  { %1321 = vmatprep.subr.bf16.mxu0 %v1415_v6  ;;  %v412_v6 = vld [vmem:[%s1833_s8 + $0x20] sm:$0xff]  ;;  %v1336_v4 = vpack.c.bf16 %v723_v2, %v722_v1 }
  0xb2   :  { %v1297_v14 = vpack.c.bf16 %v413_v13, %v412_v6  ;;  %v728_v13 = vld [vmem:[%s1835_s10 + $0x50] sm:$0xff]  ;;  %v955_v1 = vld [vmem:[%s1838_s13] ss:$0 sm:$0xff] }
 0x166   :  { %v196_v50 = vpop.f32.mrb[0].mxu0 }
 0x167   :  { %v1058_v51 = vpop.f32.mrb[1].mxu0 }
 0x16a   :  { %v201_v52 = vpop.f32.mrb[2].mxu0 }
 0x16b   :  { %v1249_v53 = vpack.c.bf16 %v201_v52, %v196_v50  ;;  %v1061_v54 = vpop.f32.mrb[3].mxu0  ;;  %v514_v50 = vpop.permute.xlu1 %513 }
 0x16c   :  { %vm521_vm10 = vcmp.eq.s32.totalorder %v1535_v15, %v514_v50  ;;  %v831_v50 = vld [vmem:[%s1837_s12 + $0x68] sm:$0xff] }
 0x16d   :  { %1250 = vmatprep.subr.bf16.mxu1 %v1249_v53  ;;  %v943_v54 = vsel %vm521_vm10, 1.0, %v1417_v8 }
 0x16e   :  { %v206_v55 = vpop.f32.mrb[4].mxu0  ;;  %1252 = vmatpush3.bf16.msra.mxu1 %v1249_v53  ;;  %v517_v53 = vpop.permute.xlu0 %516 }
 0x16f   :  { %v1064_v56 = vpop.f32.mrb[5].mxu0  ;;  %vm522_vm11 = vcmp.eq.s32.totalorder %v1535_v15, %v517_v53  ;;  %v713_v53 = vstv %s712_s29 }
 0x170   :  { %v944_v56 = vsel %vm522_vm11, 1.0, %v1417_v8 }
 0x172   :  { %v211_v58 = vpop.f32.mrb[6].mxu0 }
 0x173   :  { %v1253_v59 = vpack.c.bf16 %v211_v58, %v206_v55  ;;  %v1067_v60 = vpop.f32.mrb[7].mxu0  ;;  %v520_v55 = vpop.permute.xlu1 %519 }
 0x174   :  { %vm523_vm12 = vcmp.eq.s32.totalorder %v1535_v15, %v520_v55  ;;  %v718_v15 = vld [vmem:[%s1835_s10] sm:$0xff] }
 0x175   :  { %1254 = vmatprep.subr.bf16.mxu1 %v1253_v59  ;;  %v945_v58 = vsel %vm523_vm12, 1.0, %v1417_v8 }
 0x176   :  { %v216_v61 = vpop.f32.mrb[8].mxu0  ;;  %1256 = vmatpush3.bf16.msra.mxu1 %v1253_v59  ;;  %v946_v59 = vld [vmem:[%s1830_s5] ss:$0 sm:$0xff] }
 0x177   :  { %v1070_v62 = vpop.f32.mrb[9].mxu0  ;;  %1079 = vmatprep.subr.mxu1 %v216_v61  ;;  %vm535_vm13 = vcmp.eq.s32.totalorder %v1560_v26, %v946_v59  ;;  %v721_v26 = vld [vmem:[%s1835_s10 + $0x18] sm:$0xff]  ;;  %vm536_vm15 = vcmp.eq.s32.totalorder %v1611_v57, %v946_v59  ;;  %v818_v57 = vld [vmem:[%s1837_s12] sm:$0xff] }
 0x178   :  { %v947_v60 = vsel %vm535_vm13, 1.0, %v1417_v8  ;;  %v720_v62 = vld [vmem:[%s1835_s10 + $0x10] sm:$0xff] }
 0x179   :  { %v1332_v0 = vpack.c.bf16 %v721_v26, %v720_v62 }
 0x17a   :  { %1080 = vmatpush3.msra.mxu1 %v216_v61  ;;  %v719_v61 = vld [vmem:[%s1835_s10 + $0x8] sm:$0xff] }
 0x17b   :  { %1082 = vmatmul.mubr.msk.f32.vlgmr.msra.gmra.mrb[0].mxu1 %vm220_vm8, %v932_v63  ;;  %1290 = vmatprep.subr.bf16.mxu1 %v1289_v10  ;;  %v1328_v63 = vpack.c.bf16 %v719_v61, %v718_v15  ;;  %v832_v15 = vld [vmem:[%s1837_s12 + $0x70] sm:$0xff]  ;;  %v833_v61 = vld [vmem:[%s1837_s12 + $0x78] sm:$0xff] }
 0x17c   :  { %1292 = vmatpush3.bf16.msra.mxu1 %v1289_v10  ;;  %v1340_v10 = vpack.c.bf16 %v725_v9, %v724_v5  ;;  %v1388_v62 = vpack.c.bf16 %v833_v61, %v832_v15 }
 0x17d   :  { %1294 = vmatprep.subr.bf16.mxu1 %v1293_v12 }
 0x180   :  { %1296 = vmatpush3.bf16.msra.mxu1 %v1293_v12  ;;  %v727_v12 = vld [vmem:[%s1835_s10 + $0x48] sm:$0xff] }
 0x181   :  { %1298 = vmatprep.subr.bf16.mxu1 %v1297_v14  ;;  %v1344_v6 = vpack.c.bf16 %v727_v12, %v726_v11 }
 0x184   :  { %1300 = vmatpush3.bf16.msra.mxu1 %v1297_v14  ;;  %v729_v14 = vld [vmem:[%s1835_s10 + $0x58] sm:$0xff] }
 0x185   :  { %1302 = vmatprep.subr.bf16.mxu1 %v1301_v18  ;;  %v1348_v16 = vpack.c.bf16 %v729_v14, %v728_v13 }
 0x188   :  { %1304 = vmatpush3.bf16.msra.mxu1 %v1301_v18  ;;  %v731_v18 = vld [vmem:[%s1835_s10 + $0x68] sm:$0xff] }
 0x189   :  { %1306 = vmatprep.subr.bf16.mxu1 %v1305_v21  ;;  %v1352_v19 = vpack.c.bf16 %v731_v18, %v730_v17 }
 0x18c   :  { %1308 = vmatpush3.bf16.msra.mxu1 %v1305_v21 }
 0x18d   :  { %1310 = vmatprep.subr.bf16.mxu1 %v1309_v24 }
 0x190   :  { %1312 = vmatpush3.bf16.msra.mxu1 %v1309_v24 }
 0x191   :  { %1314 = vmatprep.subr.bf16.mxu1 %v1313_v28 }
 0x194   :  { %1316 = vmatpush3.bf16.msra.mxu1 %v1313_v28  ;;  %v948_v28 = vsel %vm536_vm15, 1.0, %v1417_v8 }
 0x195   :  { %1318 = vmatprep.subr.bf16.mxu1 %v1317_v3 }
 0x198   :  { %1320 = vmatpush3.bf16.msra.mxu1 %v1317_v3  ;;  %v1368_v3 = vpack.c.bf16 %v823_v37, %v822_v36 }
 0x24e   :  { %v1083_v32 = vpop.f32.mrb[0].mxu1 }
 0x24f   :  { %v293_v33 = vpop.f32.mrb[1].mxu1  ;;  %v307_v35 = vadd.f32 %v1083_v32, %v305_v31  ;;  %v820_v32 = vld [vmem:[%s1837_s12 + $0x10] sm:$0xff] }
 0x250   :  { %v306_v34 = vadd.f32 %v304_v30, %v293_v33  ;;  %v733_v30 = vld [vmem:[%s1835_s10 + $0x78] sm:$0xff] }
 0x251   :  { %v1356_v31 = vpack.c.bf16 %v733_v30, %v732_v29 }
 0x252   :  { %1116 = vmatprep.mubr.f32.mxu0 %v306_v34  ;;  %v821_v34 = vld [vmem:[%s1837_s12 + $0x18] sm:$0xff] }
 0x253   :  { %1117 = vmatmul.mubr.f32.vlgmr.msra.gmra.mrb[10].mxu0 %v307_v35  ;;  %v1364_v35 = vpack.c.bf16 %v821_v34, %v820_v32 }
 0x254   :  { %1158 = vmatprep.mubr.msk.f32.mxu0 %vm1416_vm0, %v1417_v8 }
 0x326   :  { %v1118_v38 = vpop.f32.mrb[10].mxu0 }
 0x327   :  { %v403_v39 = vadd.f32 %v1118_v38, %v940_v7  ;;  %v397_v40 = vpop.f32.mrb[11].mxu0  ;;  %v825_v38 = vld [vmem:[%s1837_s12 + $0x38] sm:$0xff] }
 0x328   :  { %v398_v41 = vadd.f32 %v940_v7, %v397_v40  ;;  %v824_v7 = vld [vmem:[%s1837_s12 + $0x30] sm:$0xff]  ;;  %v826_v40 = vld [vmem:[%s1837_s12 + $0x40] sm:$0xff] }
 0x329   :  { %v407_v43 = vmax.f32 %v403_v39, 0.0  ;;  %v1372_v39 = vpack.c.bf16 %v825_v38, %v824_v7 }
 0x32a   :  { %v406_v42 = vmax.f32 %v398_v41, 0.0  ;;  %v827_v41 = vld [vmem:[%s1837_s12 + $0x48] sm:$0xff] }
 0x32c   :  { %1151 = vmatprep.mubr.f32.mxu1 %v406_v42  ;;  %v1376_v42 = vpack.c.bf16 %v827_v41, %v826_v40 }
 0x32d   :  { %1152 = vmatmul.mubr.f32.vlgmr.msra.gmra.mrb[2].mxu1 %v407_v43  ;;  %v828_v43 = vld [vmem:[%s1837_s12 + $0x50] sm:$0xff] }
 0x32e   :  { %1173 = vmatprep.mubr.msk.f32.mxu1 %vm630_vm14, %v947_v60 }
 0x400   :  { %v1153_v45 = vpop.f32.mrb[2].mxu1 }
 0x401   :  { %v1681_v46 = vadd.f32 %v1153_v45, %v941_v44  ;;  %v497_v47 = vpop.f32.mrb[3].mxu1 }
 0x402   :  { %v1683_v48 = vadd.f32 %v941_v44, %v497_v47  ;;  %v829_v44 = vld [vmem:[%s1837_s12 + $0x58] sm:$0xff]  ;;  %v830_v47 = vld [vmem:[%s1837_s12 + $0x60] sm:$0xff] }
 0x403   :  { %v507_v49 = vmax.f32 %v1681_v46, 0.0  ;;  %v1380_v45 = vpack.c.bf16 %v829_v44, %v828_v43  ;;  %v954_v46 = vld [vmem:[%s1836_s11] ss:$0 sm:$0xff] }
 0x404   :  { %v506_v51 = vmax.f32 %v1683_v48, 0.0 }
 0x406   :  { %v1322_v52 = vpack.c.bf16 %v507_v49, %v506_v51 }
 0x408   :  { %1323 = vmatpush3.bf16.msra.mxu0 %v1322_v52  ;;  %v1384_v52 = vpack.c.bf16 %v831_v50, %v830_v47 }
 0x409   :  { %1329 = vmatprep.subr.bf16.mxu0 %v1328_v63 }
 0x40b   :  { %1159 = vmatmul.mubr.msk.f32.vlgmr.msra.gmra.mrb[12].mxu0 %vm114_vm1, %v943_v54  ;;  %v715_v54 = vmul.f32 %v713_v53, %v507_v49 }
 0x40c   :  { %1161 = vmatprep.mubr.msk.f32.mxu0 %vm1416_vm0, %v1417_v8  ;;  %1331 = vmatpush3.bf16.msra.mxu0 %v1328_v63 }
 0x40d   :  { %1333 = vmatprep.subr.bf16.mxu0 %v1332_v0 }
 0x40f   :  { %1162 = vmatmul.mubr.msk.f32.gmra.mrb[14].mxu0 %vm114_vm1, %v944_v56  ;;  %v714_v56 = vmul.f32 %v713_v53, %v506_v51 }
 0x410   :  { %1164 = vmatprep.mubr.msk.f32.mxu0 %vm1416_vm0, %v1417_v8  ;;  %1335 = vmatpush3.bf16.msra.mxu0 %v1332_v0  ;;  %v819_v8 = vld [vmem:[%s1837_s12 + $0x8] sm:$0xff] }
 0x411   :  { %1337 = vmatprep.subr.bf16.mxu0 %v1336_v4  ;;  %v1360_v33 = vpack.c.bf16 %v819_v8, %v818_v57 }
 0x413   :  { %1165 = vmatmul.mubr.msk.f32.gmra.mrb[16].mxu0 %vm114_vm1, %v945_v58 }
 0x414   :  { %1339 = vmatpush3.bf16.msra.mxu0 %v1336_v4 }
 0x415   :  { %1341 = vmatprep.subr.bf16.mxu0 %v1340_v10 }
 0x418   :  { %1343 = vmatpush3.bf16.msra.mxu0 %v1340_v10 }
 0x419   :  { %1345 = vmatprep.subr.bf16.mxu0 %v1344_v6 }
 0x41c   :  { %1347 = vmatpush3.bf16.msra.mxu0 %v1344_v6 }
 0x41d   :  { %1349 = vmatprep.subr.bf16.mxu0 %v1348_v16 }
 0x420   :  { %1351 = vmatpush3.bf16.msra.mxu0 %v1348_v16 }
 0x421   :  { %1353 = vmatprep.subr.bf16.mxu0 %v1352_v19 }
 0x424   :  { %1355 = vmatpush3.bf16.msra.mxu0 %v1352_v19 }
 0x425   :  { %1357 = vmatprep.subr.bf16.mxu0 %v1356_v31 }
 0x428   :  { %1359 = vmatpush3.bf16.msra.mxu0 %v1356_v31 }
 0x4de   :  { %v616_v20 = vpop.f32.mrb[12].mxu0 }
 0x4df   :  { %v1160_v21 = vpop.f32.mrb[13].mxu0 }
 0x4e2   :  { %v621_v22 = vpop.f32.mrb[14].mxu0 }
 0x4e3   :  { %v1324_v23 = vpack.c.bf16 %v621_v22, %v616_v20  ;;  %v1163_v24 = vpop.f32.mrb[15].mxu0 }
 0x4e5   :  { %1325 = vmatprep.subr.bf16.mxu1 %v1324_v23 }
 0x4e6   :  { %v626_v25 = vpop.f32.mrb[16].mxu0  ;;  %1327 = vmatpush3.bf16.msra.mxu1 %v1324_v23 }
 0x4e7   :  { %v1166_v27 = vpop.f32.mrb[17].mxu0  ;;  %1171 = vmatprep.subr.mxu1 %v626_v25 }
 0x4ea   :  { %1172 = vmatpush3.msra.mxu1 %v626_v25 }
 0x4eb   :  { %1174 = vmatmul.mubr.msk.f32.vlgmr.msra.gmra.mrb[4].mxu1 %vm630_vm14, %v948_v28  ;;  %1361 = vmatprep.subr.bf16.mxu1 %v1360_v33 }
 0x4ec   :  { %1363 = vmatpush3.bf16.msra.mxu1 %v1360_v33 }
 0x4ed   :  { %1365 = vmatprep.subr.bf16.mxu1 %v1364_v35 }
 0x4f0   :  { %1367 = vmatpush3.bf16.msra.mxu1 %v1364_v35 }
 0x4f1   :  { %1369 = vmatprep.subr.bf16.mxu1 %v1368_v3 }
 0x4f4   :  { %1371 = vmatpush3.bf16.msra.mxu1 %v1368_v3 }
 0x4f5   :  { %1373 = vmatprep.subr.bf16.mxu1 %v1372_v39 }
 0x4f8   :  { %1375 = vmatpush3.bf16.msra.mxu1 %v1372_v39 }
 0x4f9   :  { %1377 = vmatprep.subr.bf16.mxu1 %v1376_v42 }
 0x4fc   :  { %1379 = vmatpush3.bf16.msra.mxu1 %v1376_v42 }
 0x4fd   :  { %1381 = vmatprep.subr.bf16.mxu1 %v1380_v45 }
 0x500   :  { %1383 = vmatpush3.bf16.msra.mxu1 %v1380_v45 }
 0x501   :  { %1385 = vmatprep.subr.bf16.mxu1 %v1384_v52 }
 0x504   :  { %1387 = vmatpush3.bf16.msra.mxu1 %v1384_v52 }
 0x505   :  { %1389 = vmatprep.subr.bf16.mxu1 %v1388_v62 }
 0x508   :  { %1391 = vmatpush3.bf16.msra.mxu1 %v1388_v62 }
 0x5be   :  { %v1175_v55 = vpop.f32.mrb[4].mxu1 }
 0x5bf   :  { %v717_v58 = vadd.f32 %v1175_v55, %v715_v54  ;;  %v703_v59 = vpop.f32.mrb[5].mxu1 }
 0x5c0   :  { %v716_v60 = vadd.f32 %v714_v56, %v703_v59 }
 0x5c2   :  { %1208 = vmatprep.mubr.f32.mxu0 %v716_v60 }
 0x5c3   :  { %1209 = vmatmul.mubr.f32.vlgmr.msra.gmra.mrb[18].mxu0 %v717_v58 }
 0x696   :  { %v1210_v48 = vpop.f32.mrb[18].mxu0 }
 0x697   :  { %v813_v49 = vadd.f32 %v1210_v48, %v954_v46  ;;  %v807_v51 = vpop.f32.mrb[19].mxu0 }
 0x698   :  { %v808_v63 = vadd.f32 %v954_v46, %v807_v51 }
 0x699   :  { %v817_v0 = vmax.f32 %v813_v49, 0.0 }
 0x69a   :  { %v816_v26 = vmax.f32 %v808_v63, 0.0 }
 0x69c   :  { %1243 = vmatprep.mubr.f32.mxu1 %v816_v26 }
 0x69d   :  { %1244 = vmatmul.mubr.f32.vlgmr.msra.gmra.mrb[6].mxu1 %v817_v0 }
 0x770   :  { %v1245_v2 = vpop.f32.mrb[6].mxu1 }
 0x771   :  { %v913_v4 = vadd.f32 %v1245_v2, %v955_v1  ;;  %v907_v5 = vpop.f32.mrb[7].mxu1 }
 0x772   :  { %v908_v9 = vadd.f32 %v955_v1, %v907_v5 }
 0x773   :  { %v917_v10 = vmax.f32 %v913_v4, 0.0 }
 0x774   :  { %v916_v11 = vmax.f32 %v908_v9, 0.0 }
 0x775   :  { %919 = vst [vmem:[%s1839_s14 + $0x8] sm:$0xff] %v917_v10 }
 0x776   :  { %918 = vst [vmem:[%s1839_s14] sm:$0xff] %v916_v11 }
 0x777   :  { %924 = vsyncpa [#allocation3], 1 }

</bundles_post_ra>
